<compile_context>
chip_gen: v7x
topology: tpu7x:2x2x1
jax: 0.10.0
libtpu: 0.0.40
codegen_flags: <defaults>
</compile_context>

<pallas_src>
import functools

import jax
import jax.numpy as jnp
from jax.experimental import pallas as pl
from jax.experimental.pallas import tpu as pltpu

_RESIDENT_WEIGHT_BYTES_MAX = 16 * 2**20  # keep whole stack in VMEM below this


def _round_up(x, m):
    return (x + m - 1) // m * m


def _pad_cols(x, width):
    """Pad a (B, W0) array with zero columns up to (B, width). Static shapes only."""
    pad = width - x.shape[1]
    if pad == 0:
        return x
    return jnp.concatenate([x, jnp.zeros((x.shape[0], pad), x.dtype)], axis=1)


def _fused_gru_stack_kernel(x0_ref, states_ref, wx_ref, wh_ref, b_ref,
                            out_ref, xin_ref, *, hidden, dx, resident, precision):
    """One grid step == one stacked GRUCell layer.

    Per layer l (grid axis 0, sequential):
      x_in  = layer input (x0 for l==0, h'_{l-1} otherwise)   # VMEM carry, (Bp, Dx)
      gi    = x_in @ Wx_l + b_ih_l                            # (Bp, Nc) f32, [r|z|n]
      gh    = h_l  @ Wh_l + b_hh_l                            # (Bp, Nc) f32, [r|z|n]
      r = sigmoid(gi_r + gh_r); z = sigmoid(gi_z + gh_z)
      n = tanh(gi_n + r * gh_n)
      h' = (1 - z) * n + z * h_l
    """
    l = pl.program_id(0)
    wsel = l if resident else 0          # resident: whole stack in VMEM, index by layer
    H = hidden

    # Layer-0 input fills the carry buffer; later layers reuse the h' written at the
    # end of the previous grid step.
    @pl.when(l == 0)
    def _():
        xin_ref[...] = x0_ref[...].astype(xin_ref.dtype)

    cdt = xin_ref.dtype
    h_blk = states_ref[0]                                   # (Bp, Gh), zero padded

    # Two MXU matmuls per layer (no zero gate block); f32 accumulation.
    gi = jnp.dot(xin_ref[...], wx_ref[wsel],
                 preferred_element_type=jnp.float32, precision=precision)
    gh = jnp.dot(h_blk.astype(cdt), wh_ref[wsel],
                 preferred_element_type=jnp.float32, precision=precision)
    b = b_ref[wsel].astype(jnp.float32)                     # (2, Nc): [b_ih; b_hh]
    gi = gi + b[0:1, :]
    gh = gh + b[1:2, :]

    r = jax.nn.sigmoid(gi[:, 0:H] + gh[:, 0:H])
    z = jax.nn.sigmoid(gi[:, H:2 * H] + gh[:, H:2 * H])
    n = jnp.tanh(gi[:, 2 * H:3 * H] + r * gh[:, 2 * H:3 * H])

    h_prev = h_blk[:, 0:H].astype(jnp.float32)
    h_new = (1.0 - z) * n + z * h_prev                      # (Bp, H) f32

    # Full-width (lane-dense) output store; padding lanes are written as zeros.
    out_ref[0] = _pad_cols(h_new, out_ref.shape[2]).astype(out_ref.dtype)
    # Next layer's input: full-width store keeps the carry tail explicitly zero
    # (no reliance on zero weight rows to neutralize stale layer-0 data).
    xin_ref[...] = _pad_cols(h_new, dx).astype(cdt)


def multilayer_gru_cells_fwd(x0, states_padded, wx_stacked, wh_stacked, b_stacked,
                             *, hidden_size):
    """x0: (Bp, Dx); states: (L, Bp, Gh); Wx: (L, Dx, Nc); Wh: (L, Gh, Nc); b: (L, 2, Nc)."""
    L, Bp, Gh = states_padded.shape
    _, Dx, Nc = wx_stacked.shape

    w_bytes = (wx_stacked.size * wx_stacked.dtype.itemsize
               + wh_stacked.size * wh_stacked.dtype.itemsize
               + b_stacked.size * b_stacked.dtype.itemsize)
    resident = w_bytes <= _RESIDENT_WEIGHT_BYTES_MAX

    if resident:
        # Whole weight stack stays resident in VMEM: no per-layer DMA wait.
        wx_spec = pl.BlockSpec((L, Dx, Nc), lambda l: (0, 0, 0))
        wh_spec = pl.BlockSpec((L, Gh, Nc), lambda l: (0, 0, 0))
        b_spec = pl.BlockSpec((L, 2, Nc), lambda l: (0, 0, 0))
        w_block_bytes = w_bytes
    else:
        # Per-layer blocks: Pallas auto double-buffers the next layer's weight DMA
        # behind the current layer's compute.
        wx_spec = pl.BlockSpec((1, Dx, Nc), lambda l: (l, 0, 0))
        wh_spec = pl.BlockSpec((1, Gh, Nc), lambda l: (l, 0, 0))
        b_spec = pl.BlockSpec((1, 2, Nc), lambda l: (l, 0, 0))
        w_block_bytes = w_bytes // L

    compute_dtype = wx_stacked.dtype
    precision = (jax.lax.Precision.HIGHEST
                 if compute_dtype == jnp.dtype(jnp.float32) else None)

    # Explicit scoped-VMEM budget (v5e default is only 16 MiB; v7x physical is 64 MiB).
    est = (2 * w_block_bytes
           + 2 * Bp * Dx * x0.dtype.itemsize
           + 4 * Bp * Gh * states_padded.dtype.itemsize      # states-in + h'-out blocks
           + Bp * Dx * compute_dtype.itemsize)                # carry scratch
    vmem_limit = int(min(120 * 2**20, max(32 * 2**20, 2 * est)))

    kernel = functools.partial(_fused_gru_stack_kernel, hidden=hidden_size, dx=Dx,
                               resident=resident, precision=precision)

    return pl.pallas_call(
        kernel,
        out_shape=jax.ShapeDtypeStruct((L, Bp, Gh), states_padded.dtype),
        grid_spec=pltpu.PrefetchScalarGridSpec(
            num_scalar_prefetch=0,
            grid=(L,),
            in_specs=[
                pl.BlockSpec((Bp, Dx), lambda l: (0, 0)),        # layer-0 input (resident)
                pl.BlockSpec((1, Bp, Gh), lambda l: (l, 0, 0)),  # per-layer initial h
                wx_spec, wh_spec, b_spec,
            ],
            out_specs=pl.BlockSpec((1, Bp, Gh), lambda l: (l, 0, 0)),
            scratch_shapes=[pltpu.VMEM((Bp, Dx), compute_dtype)],  # layer-input carry
        ),
        # h' overwrites the padded initial-state buffer in place (no fresh output alloc).
        input_output_aliases={1: 0},
        compiler_params=pltpu.CompilerParams(
            dimension_semantics=("arbitrary",),   # layer axis is a true recurrence
            vmem_limit_bytes=vmem_limit),
    )(x0, states_padded, wx_stacked, wh_stacked, b_stacked)


class MultiLayerGRUCellsPallas:
    """JAX/Pallas port of MultiLayerGRUCells (inference forward)."""

    def __init__(self, input_size, hidden_size, num_layers, dropout, bias=True,
                 key=None, param_dtype=jnp.bfloat16):
        assert bias, "only bias=True variant is parameterized here"
        self.input_size = input_size
        self.hidden_size = hidden_size
        self.num_layers = num_layers
        self.dropout = dropout  # identity in eval mode
        if key is None:
            key = jax.random.PRNGKey(0)

        H, I = hidden_size, input_size
        Gh = _round_up(H, 128)              # lane-aligned hidden width (states / h-matmul)
        Dx = _round_up(max(I, H), 128)      # lane-aligned layer-input width (x-matmul)
        Nc = _round_up(3 * H, 128)          # gate columns [r|z|n], tightly packed
        self._Gh, self._Dx, self._Nc = Gh, Dx, Nc

        bound = 1.0 / (float(H) ** 0.5)
        self.params = []                    # raw per-layer params (torch layout) for reference
        wx_blocks, wh_blocks, b_blocks = [], [], []
        for layer in range(num_layers):
            d_in = I if layer == 0 else H
            key, k1, k2, k3, k4 = jax.random.split(key, 5)
            # Same init distribution as torch.nn.GRUCell: U(-1/sqrt(H), 1/sqrt(H)).
            w_ih = jax.random.uniform(k1, (3 * H, d_in), jnp.float32, -bound, bound)
            w_hh = jax.random.uniform(k2, (3 * H, H), jnp.float32, -bound, bound)
            b_ih = jax.random.uniform(k3, (3 * H,), jnp.float32, -bound, bound)
            b_hh = jax.random.uniform(k4, (3 * H,), jnp.float32, -bound, bound)
            self.params.append(dict(w_ih=w_ih, w_hh=w_hh, b_ih=b_ih, b_hh=b_hh))

            Wx = jnp.zeros((Dx, Nc), jnp.float32).at[0:d_in, 0:3 * H].set(w_ih.T)
            Wh = jnp.zeros((Gh, Nc), jnp.float32).at[0:H, 0:3 * H].set(w_hh.T)
            bm = jnp.zeros((2, Nc), jnp.float32)
            bm = bm.at[0, 0:3 * H].set(b_ih).at[1, 0:3 * H].set(b_hh)
            wx_blocks.append(Wx)
            wh_blocks.append(Wh)
            b_blocks.append(bm)

        # bf16 by default: the kernel is weight-streaming bound, so halving weight
        # bytes ~halves wall clock and hits the native bf16 MXU path.
        self.wx_stacked = jnp.stack(wx_blocks, axis=0).astype(param_dtype)  # (L, Dx, Nc)
        self.wh_stacked = jnp.stack(wh_blocks, axis=0).astype(param_dtype)  # (L, Gh, Nc)
        self.b_stacked = jnp.stack(b_blocks, axis=0).astype(jnp.float32)    # (L, 2,  Nc)

    def __call__(self, inp, states):
        """inp: (B, input_size); states: (num_layers, B, H) -> (num_layers, B, H)."""
        B = inp.shape[0]
        L, H = self.num_layers, self.hidden_size
        # NOTE: weight bytes are independent of batch — batching many independent
        # sequences (Bp >= 128/256) is what makes this kernel compute-bound.
        Bp = _round_up(max(B, 8), 8)
        x0 = jnp.zeros((Bp, self._Dx), inp.dtype).at[:B, :self.input_size].set(inp)
        st = jnp.zeros((L, Bp, self._Gh), states.dtype).at[:, :B, :H].set(states)
        out = multilayer_gru_cells_fwd(x0, st, self.wx_stacked, self.wh_stacked,
                                       self.b_stacked, hidden_size=H)
        return out[:, :B, :H]


def _gru_cell_ref(x, h, p):
    """Pure-JAX torch.nn.GRUCell reference (f32 parameters)."""
    H = h.shape[1]
    gi = x @ p["w_ih"].T + p["b_ih"]
    gh = h @ p["w_hh"].T + p["b_hh"]
    r = jax.nn.sigmoid(gi[:, :H] + gh[:, :H])
    z = jax.nn.sigmoid(gi[:, H:2 * H] + gh[:, H:2 * H])
    n = jnp.tanh(gi[:, 2 * H:] + r * gh[:, 2 * H:])
    return (1.0 - z) * n + z * h


if __name__ == "__main__":
    B = 4
    INPUT_SIZE = 32
    HIDDEN_SIZE = 32
    NUM_LAYERS = 3
    DROPOUT = 0.1  # identity in eval mode

    key = jax.random.PRNGKey(0)
    k_mod, k_x, k_h = jax.random.split(key, 3)

    x = jax.random.normal(k_x, (B, INPUT_SIZE), jnp.float32)
    states = jax.random.normal(k_h, (NUM_LAYERS, B, HIDDEN_SIZE), jnp.float32)

    # Pure-JAX reference (eval mode: F.dropout is identity).
    def ref_forward(params):
        xi, hs = x, []
        for i in range(NUM_LAYERS):
            hi = _gru_cell_ref(xi, states[i], params[i])
            hs.append(hi)
            xi = hi
        return jnp.stack(hs, axis=0)

    # 1) Default (bf16 weights): the perf path.
    model = MultiLayerGRUCellsPallas(INPUT_SIZE, HIDDEN_SIZE, NUM_LAYERS, DROPOUT,
                                     bias=True, key=k_mod)
    out = jax.block_until_ready(model(x, states))
    assert out.shape == (NUM_LAYERS, B, HIDDEN_SIZE), out.shape
    ref = ref_forward(model.params)
    err_bf16 = float(jnp.max(jnp.abs(out - ref)))
    assert jnp.allclose(out, ref, atol=5e-2, rtol=5e-2), err_bf16

    # 2) f32 weights with precision=HIGHEST: f32-faithful path, tight tolerance.
    model_f32 = MultiLayerGRUCellsPallas(INPUT_SIZE, HIDDEN_SIZE, NUM_LAYERS, DROPOUT,
                                         bias=True, key=k_mod,
                                         param_dtype=jnp.float32)
    out_f32 = jax.block_until_ready(model_f32(x, states))
    err_f32 = float(jnp.max(jnp.abs(out_f32 - ref)))
    assert jnp.allclose(out_f32, ref, atol=1e-4, rtol=1e-4), err_f32

    print("KERNEL_OK")
</pallas_src>

<mosaic_0001>
module attributes {stable_mosaic.version = 11 : i64} {
  func.func @_fused_gru_stack_kernel(%arg0: i32, %arg1: memref<8x128xf32, #tpu.memory_space<vmem>>, %arg2: memref<1x8x128xf32, #tpu.memory_space<vmem>>, %arg3: memref<3x128x128xbf16, #tpu.memory_space<vmem>>, %arg4: memref<3x128x128xbf16, #tpu.memory_space<vmem>>, %arg5: memref<3x2x128xf32, #tpu.memory_space<vmem>>, %arg6: memref<1x8x128xf32, #tpu.memory_space<vmem>>, %arg7: memref<8x128xbf16, #tpu.memory_space<vmem>>) attributes {dimension_semantics = [#tpu.dimension_semantics<arbitrary>], iteration_bounds = array<i64: 3>, scalar_prefetch = 0 : i64, scratch_operands = 1 : i64, tpu.core_type = #tpu.core_type<tc>, window_params = [{pipeline_mode = #tpu.pipeline_mode<synchronous>, transform_indices = @transform_0, window_bounds = array<i64: 8, 128>}, {transform_indices = @transform_1, window_bounds = array<i64: 1, 8, 128>}, {pipeline_mode = #tpu.pipeline_mode<synchronous>, transform_indices = @transform_2, window_bounds = array<i64: 3, 128, 128>}, {pipeline_mode = #tpu.pipeline_mode<synchronous>, transform_indices = @transform_3, window_bounds = array<i64: 3, 128, 128>}, {pipeline_mode = #tpu.pipeline_mode<synchronous>, transform_indices = @transform_4, window_bounds = array<i64: 3, 2, 128>}, {transform_indices = @transform_5, window_bounds = array<i64: 1, 8, 128>}]} {
    %c0_i32 = arith.constant 0 : i32
    %0 = arith.cmpi eq, %arg0, %c0_i32 : i32
    %1 = arith.extui %0 : i1 to i32
    %c0_i32_0 = arith.constant 0 : i32
    %2 = arith.cmpi ne, %1, %c0_i32_0 : i32
    scf.if %2 {
      %c0_22 = arith.constant 0 : index
      %c0_23 = arith.constant 0 : index
      %60 = vector.load %arg1[%c0_22, %c0_23] : memref<8x128xf32, #tpu.memory_space<vmem>>, vector<8x128xf32>
      %61 = arith.truncf %60 : vector<8x128xf32> to vector<8x128xbf16>
      %c0_24 = arith.constant 0 : index
      %c0_25 = arith.constant 0 : index
      %62 = vector.load %arg7[%c0_24, %c0_25] : memref<8x128xbf16, #tpu.memory_space<vmem>>, vector<8x128xbf16>
      tpu.vector_store %arg7[%c0_24, %c0_25], %61 {strides = array<i32>} : memref<8x128xbf16, #tpu.memory_space<vmem>>, vector<8x128xbf16>,
    } else {
    }
    %c0 = arith.constant 0 : index
    %c0_1 = arith.constant 0 : index
    %c0_2 = arith.constant 0 : index
    %3 = vector.load %arg2[%c0, %c0_1, %c0_2] : memref<1x8x128xf32, #tpu.memory_space<vmem>>, vector<1x8x128xf32>
    %4 = vector.shape_cast %3 : vector<1x8x128xf32> to vector<8x128xf32>
    %c0_3 = arith.constant 0 : index
    %c0_4 = arith.constant 0 : index
    %5 = vector.load %arg7[%c0_3, %c0_4] : memref<8x128xbf16, #tpu.memory_space<vmem>>, vector<8x128xbf16>
    %6 = arith.index_cast %arg0 : i32 to index
    %c0_5 = arith.constant 0 : index
    %c0_6 = arith.constant 0 : index
    %7 = vector.load %arg3[%6, %c0_5, %c0_6] : memref<3x128x128xbf16, #tpu.memory_space<vmem>>, vector<1x128x128xbf16>
    %8 = vector.shape_cast %7 : vector<1x128x128xbf16> to vector<128x128xbf16>
    %cst = arith.constant dense<0.000000e+00> : vector<8x128xf32>
    %9 = tpu.matmul %5, %8, %cst {dimension_numbers = #tpu.dot_dimension_numbers<[1], [0], [0], [1], [0, 0, 1, 1], [], []>} : vector<8x128xbf16>, vector<128x128xbf16>, vector<8x128xf32> -> vector<8x128xf32>
    %10 = arith.truncf %4 : vector<8x128xf32> to vector<8x128xbf16>
    %11 = arith.index_cast %arg0 : i32 to index
    %c0_7 = arith.constant 0 : index
    %c0_8 = arith.constant 0 : index
    %12 = vector.load %arg4[%11, %c0_7, %c0_8] : memref<3x128x128xbf16, #tpu.memory_space<vmem>>, vector<1x128x128xbf16>
    %13 = vector.shape_cast %12 : vector<1x128x128xbf16> to vector<128x128xbf16>
    %cst_9 = arith.constant dense<0.000000e+00> : vector<8x128xf32>
    %14 = tpu.matmul %10, %13, %cst_9 {dimension_numbers = #tpu.dot_dimension_numbers<[1], [0], [0], [1], [0, 0, 1, 1], [], []>} : vector<8x128xbf16>, vector<128x128xbf16>, vector<8x128xf32> -> vector<8x128xf32>
    %15 = arith.index_cast %arg0 : i32 to index
    %c0_10 = arith.constant 0 : index
    %c0_11 = arith.constant 0 : index
    %16 = vector.load %arg5[%15, %c0_10, %c0_11] : memref<3x2x128xf32, #tpu.memory_space<vmem>>, vector<1x2x128xf32>
    %17 = vector.shape_cast %16 : vector<1x2x128xf32> to vector<2x128xf32>
    %18 = vector.extract_strided_slice %17 {offsets = [0, 0], sizes = [1, 128], strides = [1, 1]} : vector<2x128xf32> to vector<1x128xf32>
    %19 = vector.broadcast %18 : vector<1x128xf32> to vector<8x128xf32>
    %20 = arith.addf %9, %19 : vector<8x128xf32>
    %21 = vector.extract_strided_slice %17 {offsets = [1, 0], sizes = [1, 128], strides = [1, 1]} : vector<2x128xf32> to vector<1x128xf32>
    %22 = vector.broadcast %21 : vector<1x128xf32> to vector<8x128xf32>
    %23 = arith.addf %14, %22 : vector<8x128xf32>
    %24 = vector.extract_strided_slice %20 {offsets = [0, 0], sizes = [8, 32], strides = [1, 1]} : vector<8x128xf32> to vector<8x32xf32>
    %25 = vector.extract_strided_slice %23 {offsets = [0, 0], sizes = [8, 32], strides = [1, 1]} : vector<8x128xf32> to vector<8x32xf32>
    %26 = arith.addf %24, %25 : vector<8x32xf32>
    %27 = arith.negf %26 : vector<8x32xf32>
    %28 = math.exp %27 : vector<8x32xf32>
    %cst_12 = arith.constant 1.000000e+00 : f32
    %29 = vector.broadcast %cst_12 : f32 to vector<8x32xf32>
    %30 = arith.addf %29, %28 : vector<8x32xf32>
    %31 = arith.divf %29, %30 : vector<8x32xf32>
    %32 = vector.extract_strided_slice %20 {offsets = [0, 32], sizes = [8, 32], strides = [1, 1]} : vector<8x128xf32> to vector<8x32xf32>
    %33 = vector.extract_strided_slice %23 {offsets = [0, 32], sizes = [8, 32], strides = [1, 1]} : vector<8x128xf32> to vector<8x32xf32>
    %34 = arith.addf %32, %33 : vector<8x32xf32>
    %35 = arith.negf %34 : vector<8x32xf32>
    %36 = math.exp %35 : vector<8x32xf32>
    %cst_13 = arith.constant 1.000000e+00 : f32
    %37 = vector.broadcast %cst_13 : f32 to vector<8x32xf32>
    %38 = arith.addf %37, %36 : vector<8x32xf32>
    %39 = arith.divf %37, %38 : vector<8x32xf32>
    %40 = vector.extract_strided_slice %20 {offsets = [0, 64], sizes = [8, 32], strides = [1, 1]} : vector<8x128xf32> to vector<8x32xf32>
    %41 = vector.extract_strided_slice %23 {offsets = [0, 64], sizes = [8, 32], strides = [1, 1]} : vector<8x128xf32> to vector<8x32xf32>
    %42 = arith.mulf %31, %41 : vector<8x32xf32>
    %43 = arith.addf %40, %42 : vector<8x32xf32>
    %44 = math.tanh %43 : vector<8x32xf32>
    %45 = vector.extract_strided_slice %4 {offsets = [0, 0], sizes = [8, 32], strides = [1, 1]} : vector<8x128xf32> to vector<8x32xf32>
    %cst_14 = arith.constant 1.000000e+00 : f32
    %46 = vector.broadcast %cst_14 : f32 to vector<8x32xf32>
    %47 = arith.subf %46, %39 : vector<8x32xf32>
    %48 = arith.mulf %47, %44 : vector<8x32xf32>
    %49 = arith.mulf %39, %45 : vector<8x32xf32>
    %50 = arith.addf %48, %49 : vector<8x32xf32>
    %cst_15 = arith.constant 0.000000e+00 : f32
    %51 = vector.broadcast %cst_15 : f32 to vector<8x96xf32>
    %52 = tpu.concatenate %50, %51 in 1 : vector<8x32xf32>, vector<8x96xf32> -> vector<8x128xf32>
    %c0_16 = arith.constant 0 : index
    %c0_17 = arith.constant 0 : index
    %c0_18 = arith.constant 0 : index
    %53 = vector.load %arg6[%c0_16, %c0_17, %c0_18] : memref<1x8x128xf32, #tpu.memory_space<vmem>>, vector<1x8x128xf32>
    %54 = vector.shape_cast %53 : vector<1x8x128xf32> to vector<8x128xf32>
    %55 = vector.shape_cast %52 : vector<8x128xf32> to vector<1x8x128xf32>
    tpu.vector_store %arg6[%c0_16, %c0_17, %c0_18], %55 {strides = array<i32>} : memref<1x8x128xf32, #tpu.memory_space<vmem>>, vector<1x8x128xf32>,
    %cst_19 = arith.constant 0.000000e+00 : f32
    %56 = vector.broadcast %cst_19 : f32 to vector<8x96xf32>
    %57 = tpu.concatenate %50, %56 in 1 : vector<8x32xf32>, vector<8x96xf32> -> vector<8x128xf32>
    %58 = arith.truncf %57 : vector<8x128xf32> to vector<8x128xbf16>
    %c0_20 = arith.constant 0 : index
    %c0_21 = arith.constant 0 : index
    %59 = vector.load %arg7[%c0_20, %c0_21] : memref<8x128xbf16, #tpu.memory_space<vmem>>, vector<8x128xbf16>
    tpu.vector_store %arg7[%c0_20, %c0_21], %58 {strides = array<i32>} : memref<8x128xbf16, #tpu.memory_space<vmem>>, vector<8x128xbf16>,
    return
  }
  func.func @transform_0(%arg0: i32) -> (i32, i32) {
    %c0_i32 = arith.constant 0 : i32
    %c0_i32_0 = arith.constant 0 : i32
    %c0_i32_1 = arith.constant 0 : i32
    return %c0_i32, %c0_i32_0 : i32, i32
  }
  func.func @transform_1(%arg0: i32) -> (i32, i32, i32) {
    %c0_i32 = arith.constant 0 : i32
    %c0_i32_0 = arith.constant 0 : i32
    %c0_i32_1 = arith.constant 0 : i32
    return %arg0, %c0_i32, %c0_i32_0 : i32, i32, i32
  }
  func.func @transform_2(%arg0: i32) -> (i32, i32, i32) {
    %c0_i32 = arith.constant 0 : i32
    %c0_i32_0 = arith.constant 0 : i32
    %c0_i32_1 = arith.constant 0 : i32
    %c0_i32_2 = arith.constant 0 : i32
    return %c0_i32, %c0_i32_0, %c0_i32_1 : i32, i32, i32
  }
  func.func @transform_3(%arg0: i32) -> (i32, i32, i32) {
    %c0_i32 = arith.constant 0 : i32
    %c0_i32_0 = arith.constant 0 : i32
    %c0_i32_1 = arith.constant 0 : i32
    %c0_i32_2 = arith.constant 0 : i32
    return %c0_i32, %c0_i32_0, %c0_i32_1 : i32, i32, i32
  }
  func.func @transform_4(%arg0: i32) -> (i32, i32, i32) {
    %c0_i32 = arith.constant 0 : i32
    %c0_i32_0 = arith.constant 0 : i32
    %c0_i32_1 = arith.constant 0 : i32
    %c0_i32_2 = arith.constant 0 : i32
    return %c0_i32, %c0_i32_0, %c0_i32_1 : i32, i32, i32
  }
  func.func @transform_5(%arg0: i32) -> (i32, i32, i32) {
    %c0_i32 = arith.constant 0 : i32
    %c0_i32_0 = arith.constant 0 : i32
    %c0_i32_1 = arith.constant 0 : i32
    return %arg0, %c0_i32, %c0_i32_0 : i32, i32, i32
  }
}

</mosaic_0001>

<bundles_post_ra>
// kernel: tpu_custom_call.1
= control target key start
LH: loop header
LB: loop body
LE: loop exit
PB: predicated region body
PF: predicated region fallthrough
CT: control target
= control target key end

     0   :  { %10 = vsyncpa [#allocation4], 0  ;;  %s1303_s0 = inlined_call_operand.vmem [shape: f32[8,128], index: 0, kind: input, shape index: {}]   ;;  %s1304_s1 = inlined_call_operand.hbm [shape: f32[3,8,128], index: 1, kind: input, shape index: {}, may-alias: {1,5}]   ;;  %s1305_s2 = inlined_call_operand.hbm [shape: bf16[3,128,128], index: 2, kind: input, shape index: {}]   ;;  %s1306_s3 = inlined_call_operand.hbm [shape: bf16[3,128,128], index: 3, kind: input, shape index: {}]   ;;  %s1307_s4 = inlined_call_operand.vmem [shape: f32[3,2,128], index: 4, kind: input, shape index: {}]   ;;  %s1308_s5 = inlined_call_operand.hbm [shape: f32[3,8,128], index: 5, kind: output, shape index: {}, may-alias: {1,5}]  }
   0x1   :  { %12 = vsyncpa [#allocation4 + $0x1], 0 }
   0x2   :  { %13 = vsyncpa [#allocation7], 0 }
   0x3   :  { %14 = vsyncpa [#allocation5], 0 }
   0x4   :  { %16 = vsyncpa [#allocation5 + $0x1], 0  ;;  %s1045_s18 = smov 0   ;;  %s1047_s19 = smov 0  }
   0x5   :  { %s1049_s20 = smov 0   ;;  %s1051_s21 = smov 0  }
   0x6 LB: > { %s1066_s22 = sadd.s32 4294967295, %s1002_s21   ;;  %s652_s23 = sadd.s32 4294967294, %s1002_s21   ;;  %s1002_s21 = sphi %s1051_s21, %s1328_s21   ;;  %s998_s20 = sphi %s1049_s20, %s1327_s20   ;;  %s994_s19 = sphi %s1047_s19, %s1326_s19   ;;  %s990_s18 = sphi %s1045_s18, %s1325_s18  }
   0x7   : > { %p63_p0 = scmp.ne.s32.totalorder %s994_s19, %s990_s18  ;;  %p1309_p1 = scmp.eq.s32.totalorder %s1066_s22, 0 }
   0x8   : > { %p156_p3 = scmp.eq.s32.totalorder %s652_s23, 2  ;;  %p653_p5 = scmp.ge.s32.totalorder %s1002_s21, 1 }
   0x9   : > { %p1075_p4 = por %p1309_p1, %p63_p0  ;;  %p163_p7 = scmp.lt.s32.totalorder %s1002_s21, 4 }
   0xa   : > { %p1080_p6 = por %p156_p3, %p63_p0  ;;  %s1004_s27 = smov [#allocation6]  }
   0xb   : > { %s1312_s24 = scalar_select %p1075_p4, 1, 0 }
   0xc   : > { %s1313_s25 = scalar_select %p1080_p6, 1, 0 }
   0xd   : > { %p1086_p9 = pnand %p653_p5, %p163_p7  ;;  %s178_s28 = sshll.u32 %s1004_s27, 4  ;;  %s179_s28 = int_to_ptr.vmem [resolvable:$true] %s178_s28 }
   0xe   : > { %s1005_s30 = smov [#allocation8]   ;;  %s846_s9 = scalar_lea.hbm %s1305_s2, 3072 }
   0xf   : > { %s1314_s26 = scalar_select %p1086_p9, 1, 0 }
  0x10   : > { %p762_p10 = pneg %p1086_p9  ;;  %s191_s6 = sshll.u32 %s1005_s30, 4  ;;  %s1098_s6 = int_to_ptr.vmem [resolvable:$true] %s191_s6 }
  0x11   : > { %p847_p12 = scmp.ne.s32.totalorder %s1305_s2, %s846_s9  ;;  %p853_p5 = scmp.lt.u32.totalorder %s846_s9, %s1305_s2 }
  0x12   : > { %p1094_p11 = pnand %p762_p10, %p1309_p1 }
  0x14   : > { %p848_p13 = pneg %p1094_p11 }
  0x16   : > { %p849_p0 = pnand %p848_p13, %p847_p12 }
  0x18   : > { %p850_p3 = pneg %p849_p0 }
  0x1a   : > { %p855_p7 = pnand %p853_p5, %p850_p3 }
  0x1c   : > { %858 = shalt.err (!%p855_p7)
}
  0x1d   : > { %s859_s14 = scalar_lea.vmem %s179_s28, 3072  ;;  %p867_p2 = scmp.lt.s32.totalorder %s179_s28, %s179_s28 }
  0x1e   : > { %p860_p10 = scmp.ne.s32.totalorder %s179_s28, %s859_s14  ;;  %p868_p6 = scmp.lt.s32.totalorder %s859_s14, %s859_s14 }
  0x20   : > { %p862_p8 = pnand %p860_p10, %p848_p13  ;;  %p869_p4 = por %p868_p6, %p867_p2 }
  0x22   : > { %p863_p1 = pneg %p862_p8 }
  0x24   : > { %p870_p9 = pnand %p869_p4, %p863_p1 }
  0x26   : > { %873 = shalt.err (!%p870_p9)
}
  0x27   : > { %s1006_s15 = smov 64   ;;  %s1007_s16 = smov 4  }
  0x28   : > { %765 = dma.hbm_to_vmem [thread:$0]  (!%p1094_p11), %s1305_s2, 3072, %s179_s28, [#allocation7], %s1006_s15, %s1006_s15, %s1007_s16  }
  0x29   : > { %s874_s7 = scalar_lea.hbm %s1306_s3, 3072 }
  0x2a   : > { %p875_p8 = scmp.ne.s32.totalorder %s1306_s3, %s874_s7  ;;  %p881_p4 = scmp.lt.u32.totalorder %s874_s7, %s1306_s3 }
  0x2c   : > { %p877_p1 = pnand %p875_p8, %p848_p13 }
  0x2e   : > { %p878_p2 = pneg %p877_p1 }
  0x30   : > { %p883_p6 = pnand %p881_p4, %p878_p2 }
  0x32   : > { %886 = shalt.err (!%p883_p6)
}
  0x33   : > { %s887_s28 = scalar_lea.vmem %s1098_s6, 3072  ;;  %p895_p3 = scmp.lt.s32.totalorder %s1098_s6, %s1098_s6 }
  0x34   : > { %p888_p9 = scmp.ne.s32.totalorder %s1098_s6, %s887_s28  ;;  %p896_p5 = scmp.lt.s32.totalorder %s887_s28, %s887_s28 }
  0x36   : > { %p890_p12 = pnand %p888_p9, %p848_p13  ;;  %p897_p7 = por %p896_p5, %p895_p3 }
  0x38   : > { %p891_p0 = pneg %p890_p12 }
  0x3a   : > { %p898_p10 = pnand %p897_p7, %p891_p0 }
  0x3c   : > { %901 = shalt.err (!%p898_p10)
}
  0x3d   : > { %768 = dma.hbm_to_vmem [thread:$0]  (!%p1094_p11), %s1306_s3, 3072, %s1098_s6, [#allocation7], %s1006_s15, %s1006_s15, %s1007_s16  }
  0x3e   : > { %s1148_s14 = sadd.s32 1, %s1002_s21   ;;  %s50_s29 = sadd.s32 1, %s998_s20 }
  0x3f   : > { %s47_s17 = ssub.s32 %s1002_s21, %s1148_s14  ;;  %p57_p13 = scmp.ne.s32.totalorder %s998_s20, %s994_s19 }
  0x40   : > { %p48_p8 = scmp.eq.s32.totalorder %s47_s17, 0  ;;  %p58_p1 = scmp.eq.s32.totalorder %s1002_s21, 0 }
  0x41   : > { %p1316_p2 = scmp.eq.s32.totalorder %s1066_s22, 2  ;;  %p779_p6 = scmp.lt.s32.totalorder %s1002_s21, 3 }
  0x42   : > { %s1164_s27 = scalar_select %p48_p8, %s998_s20, %s50_s29  }
  0x43   : > { %p1158_p4 = por %p1316_p2, %p57_p13  ;;  %p59_p9 = por %p58_p1, %p57_p13 }
  0x44   : > { %s208_s30 = sand.u32 1, %s998_s20   ;;  %s658_s6 = sshll.u32 %s1002_s21, 7 }
  0x45   : > { %s657_s7 = sshll.u32 %s208_s30, 3  ;;  %s1171_s8 = scalar_lea.hbm %s1304_s1, %s658_s6 }
  0x46   : > { %s212_s9 = scalar_lea.vmem [#allocation3], %s657_s7  ;;  %p1175_p11 = pnand %p779_p6, %p59_p9 }
  0x47   : > { %s219_s10 = sshll.u32 %s212_s9, 4  ;;  %s209_s28 = scalar_lea.sflag [#allocation4], %s208_s30  ;;  %s1173_s10 = int_to_ptr.vmem [resolvable:$true] %s219_s10 }
  0x48   : > { %s902_s12 = scalar_lea.hbm %s1171_s8, 128  ;;  %p904_p0 = pneg %p1175_p11 }
  0x49   : > { %p903_p12 = scmp.ne.s32.totalorder %s1171_s8, %s902_s12  ;;  %s907_s17 = scalar_lea.hbm %s1304_s1, 384 }
  0x4a   : > { %p908_p7 = scmp.lt.u32.totalorder %s1171_s8, %s1304_s1  ;;  %p909_p10 = scmp.lt.u32.totalorder %s907_s17, %s902_s12 }
  0x4b   : > { %p905_p3 = pnand %p904_p0, %p903_p12  ;;  %p911_p8 = scmp.lt.u32.totalorder %s902_s12, %s1171_s8 }
  0x4c   : > { %p910_p13 = por %p909_p10, %p908_p7 }
  0x4d   : > { %p906_p5 = pneg %p905_p3 }
  0x4e   : > { %p912_p1 = por %p911_p8, %p910_p13 }
  0x50   : > { %p913_p2 = pnand %p912_p1, %p906_p5 }
  0x52   : > { %916 = shalt.err (!%p913_p2)
}
  0x53   : > { %s917_s30 = scalar_lea.vmem %s1173_s10, 128  ;;  %s1008_s15 = smov [#allocation3]  }
  0x54   : > { %p918_p6 = scmp.ne.s32.totalorder %s1173_s10, %s917_s30  ;;  %s922_s16 = sshll.u32 %s1008_s15, 4  ;;  %s923_s16 = int_to_ptr.vmem [resolvable:$false] %s922_s16 }
  0x55   : > { %s924_s9 = scalar_lea.vmem %s923_s16, 256  ;;  %p925_p3 = scmp.lt.s32.totalorder %s1173_s10, %s923_s16 }
  0x56   : > { %p920_p9 = pnand %p918_p6, %p904_p0  ;;  %p926_p7 = scmp.lt.s32.totalorder %s924_s9, %s917_s30 }
  0x58   : > { %p921_p12 = pneg %p920_p9  ;;  %p927_p10 = por %p926_p7, %p925_p3 }
  0x5a   : > { %p928_p13 = pnand %p927_p10, %p921_p12 }
  0x5c   : > { %931 = shalt.err (!%p928_p13)
}
  0x5d   : > { %772 = dma.hbm_to_vmem [thread:$0]  (!%p1175_p11), %s1171_s8, 128, %s1173_s10, %s209_s28  }
  0x5e   : > { %p1319_p5 = scmp.ne.s32.totalorder %s1314_s26, 0 }
  0x5f   : > { %s1207_s12 = sand.u32 (!%p1319_p5), 1, %s994_s19   ;;  %p1320_p0 = scmp.ne.s32.totalorder (!%p1319_p5), %s1312_s24, 0 }
  0x60   : > { %228 = sbr.rel (%p1319_p5) target bundleno = 863 (0x35f), region = 40  ;;  %s660_s13 = sshll.u32 (!%p1319_p5), %s1207_s12, 3 }
  0x61   : > { %s231_s29 = scalar_lea.sflag (!%p1319_p5), [#allocation4], %s1207_s12  ;;  %s1211_s17 = scalar_lea.vmem (!%p1319_p5), [#allocation3], %s660_s13 }
  0x67   : > { %977 = dma.done.wait (%p1320_p0), %s231_s29, 128  }
  0x68   : > { %979 = vsyncadd (%p1320_p0), %s231_s29, 4294967168  ;;  %p1321_p11 = scmp.eq.s32.totalorder %s1066_s22, 0 }
  0x6a   : > { %981 = dma.done.wait (%p1321_p11), [#allocation7], 6144   ;;  %p1322_p8 = pmov %p1321_p11 }
  0x6b   : > { %s1221_s26 = scalar_lea.vmem [#allocation9], %s660_s13  ;;  %p1323_p1 = scmp.ne.s32.totalorder %s1066_s22, 0 }
  0x6c   : > { %983 = vsyncadd (%p1322_p8), [#allocation7], 4294961152  ;;  %v274_v0 = vld [vmem:[%s1303_s0] sm:$0xff] (!%p1323_p1) }
  0x6d   : > { %273 = sbr.rel (%p1323_p1) target bundleno = 116 (0x74), region = 56  ;;  %v275_v1 = vpack.c.bf16 (!%p1323_p1), %v274_v0, %v274_v0 }
  0x6f   : > { %276 = vst [vmem:[#allocation2] sm:$0xf] (!%p1323_p1), %v275_v1 }
  0x74 PF: > { %s690_s24 = sshll.u32 %s1066_s22, 6  ;;  %v1009_v2 = vmov 0.0   ;;  %vm1010_vm0 = vmmov 0   ;;  %v277_v19 = vld [vmem:[%s1211_s17] sm:$0xff]  ;;  %v320_v22 = vlaneseq  ;;  %s668_s7 = sshll.u32 %s1066_s22, 1  ;;  %vm538_vm1 = vcmask 261120  }
  0x75   : > { %710 = vmatprep.subr.bf16.mxu0 %v1009_v2  ;;  %730 = vmatprep.subr.bf16.mxu1 %v1009_v2  ;;  %s1229_s11 = scalar_lea.vmem [#allocation6], %s690_s24  ;;  %s1232_s28 = scalar_lea.vmem [#allocation8], %s690_s24  ;;  %v298_v21 = vpack.c.bf16 %v277_v19, %v277_v19 }
  0x76   : > { %v824_v3 = vld [vmem:[%s1229_s11] sm:$0xff]   ;;  %726 = vmatprep.mubr.msk.bf16.mxu0 %vm1010_vm0, %v1009_v2  ;;  %746 = vmatprep.mubr.msk.bf16.mxu1 %vm1010_vm0, %v1009_v2  ;;  %v826_v5 = vld [vmem:[%s1229_s11 + $0x8] sm:$0xff]   ;;  %v828_v7 = vld [vmem:[%s1229_s11 + $0x10] sm:$0xff]   ;;  %v321_v23 = vshrl.u32 %v320_v22, 7  ;;  %s318_s15 = scalar_lea.vmem %s1307_s4, %s668_s7  ;;  %s1011_s16 = smov 64  }
  0x77   : > { %v825_v4 = vld [vmem:[%s1232_s28] sm:$0xff]   ;;  %711 = vmatpush3.bf16.msra.mxu0 %v824_v3  ;;  %v827_v6 = vld [vmem:[%s1232_s28 + $0x8] sm:$0xff]   ;;  %v829_v8 = vld [vmem:[%s1232_s28 + $0x10] sm:$0xff]   ;;  %s1012_s9 = smov 96   ;;  %s1013_s13 = smov 32  }
  0x78   : > { %731 = vmatpush3.bf16.msra.mxu1 %v825_v4  ;;  %712 = vmatprep.subr.bf16.mxu0 %v1009_v2  ;;  %v830_v9 = vld [vmem:[%s1229_s11 + $0x18] sm:$0xff]   ;;  %v832_v11 = vld [vmem:[%s1229_s11 + $0x20] sm:$0xff]   ;;  %v834_v13 = vld [vmem:[%s1229_s11 + $0x28] sm:$0xff]   ;;  %v414_v24 = vsub.s32 1, %v321_v23  ;;  %v322_v36 = vsub.s32 0, %v321_v23  ;;  %s687_s29 = sshll.u32 %s1066_s22, 7 }
  0x79   : > { %732 = vmatprep.subr.bf16.mxu1 %v1009_v2  ;;  %v831_v10 = vld [vmem:[%s1232_s28 + $0x18] sm:$0xff]   ;;  %v833_v12 = vld [vmem:[%s1232_s28 + $0x20] sm:$0xff]   ;;  %v835_v14 = vld [vmem:[%s1232_s28 + $0x28] sm:$0xff]   ;;  %s557_s17 = sshll.u32 %s1221_s26, 4  ;;  %s1259_s24 = scalar_lea.hbm %s1308_s5, %s687_s29  ;;  %s1261_s17 = int_to_ptr.vmem [resolvable:$true] %s557_s17 }
  0x7a   : > { %v836_v15 = vld [vmem:[%s1229_s11 + $0x30] sm:$0xff]   ;;  %v838_v17 = vld [vmem:[%s1229_s11 + $0x38] sm:$0xff]   ;;  %v278_v20 = vld [vmem:[#allocation2] sm:$0xf]  ;;  %s544_s11 = scalar_lea.sflag [#allocation5], %s1207_s12  ;;  %s1014_s22 = smov [#allocation9]  }
  0x7b   : > { %713 = vmatpush3.bf16.msra.mxu0 %v826_v5  ;;  %v837_v16 = vld [vmem:[%s1232_s28 + $0x30] sm:$0xff]   ;;  %v839_v18 = vld [vmem:[%s1232_s28 + $0x38] sm:$0xff]   ;;  %v319_v25 = vld [vmem:[%s318_s15] sm:$0x3]  ;;  %s932_s28 = scalar_lea.vmem %s1261_s17, 128  ;;  %s936_s7 = sshll.u32 %s1014_s22, 4  ;;  %s937_s7 = int_to_ptr.vmem [resolvable:$false] %s936_s7 }
  0x7c   : > { %733 = vmatpush3.bf16.msra.mxu1 %v827_v6  ;;  %714 = vmatprep.subr.bf16.mxu0 %v1009_v2  ;;  %v415_v26 = vrot.slane %v319_v25, %v414_v24  ;;  %v323_v37 = vrot.slane %v319_v25, %v322_v36  ;;  %p933_p2 = scmp.ne.s32.totalorder %s1261_s17, %s932_s28  ;;  %s938_s6 = scalar_lea.vmem %s937_s7, 256 }
  0x7d   : > { %734 = vmatprep.subr.bf16.mxu1 %v1009_v2  ;;  %p939_p12 = scmp.lt.s32.totalorder %s1261_s17, %s937_s7  ;;  %p940_p3 = scmp.lt.s32.totalorder %s938_s6, %s932_s28 }
  0x7e   : > { %p934_p6 = pnand %p933_p2, %p1158_p4 }
  0x7f   : > { %715 = vmatpush3.bf16.msra.mxu0 %v828_v7  ;;  %p941_p7 = por %p940_p3, %p939_p12 }
  0x80   : > { %735 = vmatpush3.bf16.msra.mxu1 %v829_v8  ;;  %716 = vmatprep.subr.bf16.mxu0 %v1009_v2  ;;  %p935_p9 = pneg %p934_p6 }
  0x81   : > { %736 = vmatprep.subr.bf16.mxu1 %v1009_v2 }
  0x82   : > { %p942_p10 = pnand %p941_p7, %p935_p9 }
  0x83   : > { %717 = vmatpush3.bf16.msra.mxu0 %v830_v9 }
  0x84   : > { %737 = vmatpush3.bf16.msra.mxu1 %v831_v10  ;;  %718 = vmatprep.subr.bf16.mxu0 %v1009_v2 }
  0x85   : > { %738 = vmatprep.subr.bf16.mxu1 %v1009_v2 }
  0x87   : > { %719 = vmatpush3.bf16.msra.mxu0 %v832_v11 }
  0x88   : > { %739 = vmatpush3.bf16.msra.mxu1 %v833_v12  ;;  %720 = vmatprep.subr.bf16.mxu0 %v1009_v2 }
  0x89   : > { %740 = vmatprep.subr.bf16.mxu1 %v1009_v2 }
  0x8b   : > { %721 = vmatpush3.bf16.msra.mxu0 %v834_v13 }
  0x8c   : > { %741 = vmatpush3.bf16.msra.mxu1 %v835_v14  ;;  %722 = vmatprep.subr.bf16.mxu0 %v1009_v2 }
  0x8d   : > { %742 = vmatprep.subr.bf16.mxu1 %v1009_v2 }
  0x8f   : > { %723 = vmatpush3.bf16.msra.mxu0 %v836_v15 }
  0x90   : > { %743 = vmatpush3.bf16.msra.mxu1 %v837_v16  ;;  %724 = vmatprep.subr.bf16.mxu0 %v1009_v2 }
  0x91   : > { %744 = vmatprep.subr.bf16.mxu1 %v1009_v2 }
  0x93   : > { %725 = vmatpush3.bf16.msra.mxu0 %v838_v17 }
  0x94   : > { %745 = vmatpush3.bf16.msra.mxu1 %v839_v18 }
  0x96   : > { %727 = vmatmul.mubr.bf16.vlgmr.msra.gmra.mrb[0].mxu0 %v278_v20 }
  0x97   : > { %747 = vmatmul.mubr.bf16.vlgmr.msra.gmra.mrb[0].mxu1 %v298_v21 }
 0x169   : > { %v406_v27 = vpop.f32.mrb[0].mxu0 }
 0x16a   : > { %v498_v28 = vpop.f32.mrb[0].mxu1  ;;  %v728_v29 = vpop.f32.mrb[1].mxu0  ;;  %v407_v38 = vadd.f32 %v406_v27, %v323_v37 }
 0x16b   : > { %v499_v30 = vadd.f32 %v498_v28, %v415_v26  ;;  %v748_v31 = vpop.f32.mrb[1].mxu1  ;;  %v409_v32 = vpop.f32.mrb[2].mxu0 }
 0x16c   : > { %v501_v33 = vpop.f32.mrb[2].mxu1  ;;  %v729_v34 = vpop.f32.mrb[3].mxu0 }
 0x16d   : > { %512 = vrot.lane.b32.xlu0 %v499_v30, %s1011_s16  ;;  %v749_v35 = vpop.f32.mrb[3].mxu1  ;;  %v504_v39 = vadd.f32 %v499_v30, %v407_v38 }
 0x16f   : > { %v685_v40 = vmul.f32 -1.442695, %v504_v39 }
 0x171   : > { %840 = vpow2.f32 %v685_v40 }
 0x17b   : > { %v841_v41 = vpop.eup %840 }
 0x17c   : > { %v508_v42 = vadd.f32 1.0, %v841_v41 }
 0x17e   : > { %842 = vrcp.f32 %v508_v42 }
 0x188   : > { %v843_v43 = vpop.eup %842 }
 0x189   : > { %v522_v50 = vsub.f32 1.0, %v843_v43 }
 0x1df   : > { %v513_v44 = vpop.permute.xlu0 %512 }
 0x1e0   : > { %v515_v45 = vmul.f32 %v843_v43, %v513_v44 }
 0x1e2   : > { %517 = vrot.lane.b32.xlu0 %v515_v45, %s1011_s16 }
 0x254   : > { %v518_v46 = vpop.permute.xlu0 %517 }
 0x255   : > { %v520_v47 = vadd.f32 %v518_v46, %v407_v38 }
 0x257   : > { %844 = vtanh.f32 %v520_v47 }
 0x261   : > { %v845_v48 = vpop.eup %844 }
 0x262   : > { %524 = vrot.lane.b32.xlu1 %v845_v48, %s1012_s9 }
 0x266   : > { %529 = vrot.lane.b32.xlu1 %v277_v19, %s1013_s13 }
 0x2d4   : > { %v525_v49 = vpop.permute.xlu1 %524 }
 0x2d5   : > { %v527_v52 = vmul.f32 %v525_v49, %v522_v50 }
 0x2d8   : > { %v530_v51 = vpop.permute.xlu1 %529 }
 0x2d9   : > { %v532_v53 = vmul.f32 %v843_v43, %v530_v51 }
 0x2db   : > { %v533_v54 = vadd.f32 %v532_v53, %v527_v52 }
 0x2dd   : > { %535 = vrot.lane.b32.xlu0 %v533_v54, %s1012_s9 }
 0x34f   : > { %v536_v55 = vpop.permute.xlu0 %535 }
 0x350   : > { %v539_v56 = vsel %vm538_vm1, %v536_v55, 0.0 }
 0x351   : > { %540 = vst [vmem:[%s1221_s26] sm:$0xff] %v539_v56  ;;  %v541_v57 = vpack.c.bf16 %v539_v56, %v539_v56 }
 0x352   : > { %945 = shalt.err (!%p942_p10)
}
 0x353   : > { %s946_s12 = scalar_lea.hbm %s1259_s24, 128  ;;  %s950_s15 = scalar_lea.hbm %s1308_s5, 384 }
 0x354   : > { %p947_p13 = scmp.ne.s32.totalorder %s1259_s24, %s946_s12  ;;  %p951_p11 = scmp.lt.u32.totalorder %s1259_s24, %s1308_s5 }
 0x355   : > { %p952_p8 = scmp.lt.u32.totalorder %s950_s15, %s946_s12  ;;  %p954_p2 = scmp.lt.u32.totalorder %s946_s12, %s1259_s24 }
 0x356   : > { %p948_p5 = pnand %p947_p13, %p1158_p4 }
 0x357   : > { %p953_p1 = por %p952_p8, %p951_p11 }
 0x358   : > { %p949_p0 = pneg %p948_p5 }
 0x359   : > { %p955_p6 = por %p954_p2, %p953_p1 }
 0x35b   : > { %p956_p9 = pnand %p955_p6, %p949_p0 }
 0x35d   : > { %959 = shalt.err (!%p956_p9)
}
 0x35e   : > { %760 = dma.vmem_to_hbm [thread:$0]  (%p1158_p4), %s1261_s17, 128, %s1259_s24, %s544_s11   ;;  %542 = vst [vmem:[#allocation2] sm:$0xf] %v541_v57 }
 0x35f PF: > { %p782_p12 = scmp.ge.s32.totalorder %s1002_s21, 2  ;;  %s569_s13 = sand.u32 1, %s990_s18  }
 0x360   : > { %p1324_p3 = scmp.ne.s32.totalorder %s1313_s25, 0  ;;  %s570_s29 = scalar_lea.sflag [#allocation5], %s569_s13 }
 0x362   : > { %p774_p7 = pnand %p782_p12, %p1324_p3 }
 0x364   : > { %985 = dma.done.wait (!%p774_p7), %s570_s29, 128  }
 0x365   : > { %987 = vsyncadd (!%p774_p7), %s570_s29, 4294967168  ;;  %p19_p10 = scmp.ge.s32.totalorder %s1148_s14, 5   ;;  %s1325_s18 = smov %s994_s19 }
 0x366   : > { %s1326_s19 = smov %s998_s20  ;;  %s1327_s20 = smov %s1164_s27 }
 0x367   : > { %s1328_s21 = smov %s1148_s14  ;;  %21 = sbr.rel (!%p19_p10) target bundleno = 6 (0x6), region = 100 }
 0x36e   :  { %575 = vsyncpa [#allocation4], 1 }
 0x36f   :  { %577 = vsyncpa [#allocation4 + $0x1], 1 }
 0x370   :  { %578 = vsyncpa [#allocation7], 1 }
 0x371   :  { %579 = vsyncpa [#allocation5], 1 }
 0x372   :  { %581 = vsyncpa [#allocation5 + $0x1], 1 }

</bundles_post_ra>
